<compile_context>
chip_gen: v6e
topology: v6e:2x2x1
jax: 0.10.0
libtpu: 0.0.40
codegen_flags: <defaults>
</compile_context>

<pallas_src>
import functools

import jax
import jax.numpy as jnp
from jax.experimental import pallas as pl
from jax.experimental.pallas import tpu as pltpu

_LANES = 128
_SUBLANES = 8
_ROWS_CHUNK = 32                    # inner strip: 32x128 f32 = 4 vregs / channel
_VMEM_BUDGET = 24 * 1024 * 1024     # double-buffered in+out block budget
_MIN_GRID_STEPS = 4                 # >= 2 * TensorCores (v7x megacore)


def _cdiv(a, b):
    return -(-a // b)


def _conv1x1_tanh_kernel(w_ref, x_ref, o_ref, *, c_in, c_out, rows_chunk):
    # w_ref: (c_out*c_in,) f32 weight in SMEM (scalar prefetch), PyTorch layout w[o, c].
    # x_ref: (c_in, rows_tile, 128)  VMEM block (batch dim squeezed) - dense tiles.
    # o_ref: (c_out, rows_tile, 128) VMEM block - dense, unmasked lane stores.
    rows_tile = x_ref.shape[1]

    def do_chunk(row0, nrows):
        sl = pl.ds(row0, nrows)
        for o in range(c_out):
            # Scalar-broadcast MAC; per-op promotion keeps the accumulator in f32
            # without materializing the whole tile in f32 (bf16 inputs stay cheap).
            acc = w_ref[o * c_in] * x_ref[0, sl, :]
            for c in range(1, c_in):
                acc = acc + w_ref[o * c_in + c] * x_ref[c, sl, :]
            o_ref[o, sl, :] = jnp.tanh(acc).astype(o_ref.dtype)

    n_full, rem = divmod(rows_tile, rows_chunk)
    if 0 < n_full <= 4:
        # Short fixed trip count: unroll statically.
        for i in range(n_full):
            do_chunk(i * rows_chunk, rows_chunk)
    elif n_full > 4:
        def body(i, carry):
            row0 = pl.multiple_of(i * rows_chunk, rows_chunk)
            do_chunk(row0, rows_chunk)
            return carry
        jax.lax.fori_loop(0, n_full, body, 0, unroll=2)
    if rem > 0:
        do_chunk(n_full * rows_chunk, rem)


def _choose_rows_tile(rows, n_batch, c_in, c_out, itemsize):
    # Largest multiple-of-8 row tile (or full extent) within the VMEM budget.
    per_row_bytes = 2 * (c_in + c_out) * _LANES * itemsize  # double-buffered in+out
    cap = max(_SUBLANES, (_VMEM_BUDGET // per_row_bytes) // _SUBLANES * _SUBLANES)
    tile = rows if rows <= cap else cap
    if tile < rows:
        tile = max(_SUBLANES, (tile // _SUBLANES) * _SUBLANES)
    # Megacore occupancy: shrink the tile until the grid has enough parallel steps.
    while n_batch * _cdiv(rows, tile) < _MIN_GRID_STEPS and tile > _SUBLANES:
        half = max(_SUBLANES, ((tile // 2) // _SUBLANES) * _SUBLANES)
        if half == tile:
            break
        tile = half
    return tile


@jax.jit
def output_inter_block(x_nchw, weight_oi):
    """1x1 conv (no bias) + tanh. x_nchw: (N, C_in, H, W); weight_oi: (C_out, C_in).

    Returns (N, C_out, H, W) in the input dtype.
    """
    N, C_in, H, W = x_nchw.shape
    C_out = weight_oi.shape[0]
    HW = H * W
    HW_pad = _cdiv(HW, _LANES) * _LANES

    # NCHW stays NCHW: collapse contiguous H,W (free), pad only if HW % 128 != 0.
    x3 = x_nchw.reshape(N, C_in, HW)
    if HW_pad != HW:
        x3 = jnp.pad(x3, ((0, 0), (0, 0), (0, HW_pad - HW)))
    rows = HW_pad // _LANES
    x4 = x3.reshape(N, C_in, rows, _LANES)   # spatial axis is now sublane x lane dense

    # Tiny weight -> flat f32 vector, scalar-prefetched into SMEM.
    w_flat = weight_oi.reshape(C_out * C_in).astype(jnp.float32)

    itemsize = x_nchw.dtype.itemsize
    rows_tile = _choose_rows_tile(rows, N, C_in, C_out, itemsize)
    n_tiles = _cdiv(rows, rows_tile)
    rows_chunk = min(_ROWS_CHUNK, rows_tile)

    kernel = functools.partial(_conv1x1_tanh_kernel, c_in=C_in, c_out=C_out,
                               rows_chunk=rows_chunk)

    block_bytes = (C_in + C_out) * rows_tile * _LANES * itemsize
    vmem_limit = int(max(32 * 1024 * 1024, 2 * block_bytes + (4 << 20)))

    cost = pl.CostEstimate(
        flops=2 * N * HW * C_in * C_out,
        transcendentals=N * HW * C_out,
        bytes_accessed=N * HW * (C_in + C_out) * itemsize + C_in * C_out * 4,
    )

    grid_spec = pltpu.PrefetchScalarGridSpec(
        num_scalar_prefetch=1,
        grid=(N, n_tiles),
        in_specs=[
            # (None, C_in, rows_tile, 128): batch squeezed, channels as slabs,
            # spatial dense on (sublane, lane).
            pl.BlockSpec((None, C_in, rows_tile, _LANES),
                         lambda n, t, w: (n, 0, t, 0)),
        ],
        out_specs=pl.BlockSpec((None, C_out, rows_tile, _LANES),
                               lambda n, t, w: (n, 0, t, 0)),
    )

    out4 = pl.pallas_call(
        kernel,
        out_shape=jax.ShapeDtypeStruct((N, C_out, rows, _LANES), x_nchw.dtype),
        grid_spec=grid_spec,
        compiler_params=pltpu.CompilerParams(
            dimension_semantics=("parallel", "parallel"),
            vmem_limit_bytes=vmem_limit),
        cost_estimate=cost,
    )(w_flat, x4)

    out3 = out4.reshape(N, C_out, HW_pad)
    if HW_pad != HW:
        out3 = out3[:, :, :HW]
    return out3.reshape(N, C_out, H, W)


if __name__ == "__main__":
    key = jax.random.PRNGKey(0)
    k_x, k_w = jax.random.split(key)

    N, fmap, Hs, Ws = 2, 4, 16, 16
    x = jax.random.normal(k_x, (N, fmap, Hs, Ws), dtype=jnp.float32)
    # Conv2d(fmap, 3, 1, bias=False) weight: (3, fmap, 1, 1) -> squeezed to (3, fmap)
    weight = jax.random.normal(k_w, (3, fmap), dtype=jnp.float32) * 0.1

    out = output_inter_block(x, weight)
    out = jax.block_until_ready(out)

    # Reference check in plain JAX (same math as PyTorch 1x1 conv + tanh).
    ref = jnp.tanh(jnp.einsum("nchw,oc->nohw", x, weight))
    assert out.shape == (N, 3, Hs, Ws)
    assert jnp.allclose(out, ref, atol=1e-4, rtol=1e-5)

    print("KERNEL_OK")
</pallas_src>

<mosaic_0001>
module attributes {stable_mosaic.version = 11 : i64} {
  func.func @_conv1x1_tanh_kernel(%arg0: i32, %arg1: i32, %arg2: memref<12xf32, #tpu.memory_space<smem>>, %arg3: memref<1x4x2x128xf32, #tpu.memory_space<vmem>>, %arg4: memref<1x3x2x128xf32, #tpu.memory_space<vmem>>) attributes {dimension_semantics = [#tpu.dimension_semantics<parallel>, #tpu.dimension_semantics<parallel>], iteration_bounds = array<i64: 2, 1>, scalar_prefetch = 1 : i64, scratch_operands = 0 : i64, tpu.core_type = #tpu.core_type<tc>, window_params = [{transform_indices = @transform_0, window_bounds = array<i64: 1, 4, 2, 128>}, {transform_indices = @transform_1, window_bounds = array<i64: 1, 3, 2, 128>}]} {
    %c0 = arith.constant 0 : index
    %0 = memref.load %arg2[%c0] : memref<12xf32, #tpu.memory_space<smem>>
    %c0_0 = arith.constant 0 : index
    %c0_1 = arith.constant 0 : index
    %c0_2 = arith.constant 0 : index
    %c0_3 = arith.constant 0 : index
    %1 = vector.load %arg3[%c0_0, %c0_1, %c0_2, %c0_3] : memref<1x4x2x128xf32, #tpu.memory_space<vmem>>, vector<1x1x2x128xf32>
    %2 = vector.shape_cast %1 : vector<1x1x2x128xf32> to vector<2x128xf32>
    %3 = vector.broadcast %0 : f32 to vector<2x128xf32>
    %4 = arith.mulf %3, %2 : vector<2x128xf32>
    %c1 = arith.constant 1 : index
    %5 = memref.load %arg2[%c1] : memref<12xf32, #tpu.memory_space<smem>>
    %c0_4 = arith.constant 0 : index
    %c1_5 = arith.constant 1 : index
    %c0_6 = arith.constant 0 : index
    %c0_7 = arith.constant 0 : index
    %6 = vector.load %arg3[%c0_4, %c1_5, %c0_6, %c0_7] : memref<1x4x2x128xf32, #tpu.memory_space<vmem>>, vector<1x1x2x128xf32>
    %7 = vector.shape_cast %6 : vector<1x1x2x128xf32> to vector<2x128xf32>
    %8 = vector.broadcast %5 : f32 to vector<2x128xf32>
    %9 = arith.mulf %8, %7 : vector<2x128xf32>
    %10 = arith.addf %4, %9 : vector<2x128xf32>
    %c2 = arith.constant 2 : index
    %11 = memref.load %arg2[%c2] : memref<12xf32, #tpu.memory_space<smem>>
    %c0_8 = arith.constant 0 : index
    %c2_9 = arith.constant 2 : index
    %c0_10 = arith.constant 0 : index
    %c0_11 = arith.constant 0 : index
    %12 = vector.load %arg3[%c0_8, %c2_9, %c0_10, %c0_11] : memref<1x4x2x128xf32, #tpu.memory_space<vmem>>, vector<1x1x2x128xf32>
    %13 = vector.shape_cast %12 : vector<1x1x2x128xf32> to vector<2x128xf32>
    %14 = vector.broadcast %11 : f32 to vector<2x128xf32>
    %15 = arith.mulf %14, %13 : vector<2x128xf32>
    %16 = arith.addf %10, %15 : vector<2x128xf32>
    %c3 = arith.constant 3 : index
    %17 = memref.load %arg2[%c3] : memref<12xf32, #tpu.memory_space<smem>>
    %c0_12 = arith.constant 0 : index
    %c3_13 = arith.constant 3 : index
    %c0_14 = arith.constant 0 : index
    %c0_15 = arith.constant 0 : index
    %18 = vector.load %arg3[%c0_12, %c3_13, %c0_14, %c0_15] : memref<1x4x2x128xf32, #tpu.memory_space<vmem>>, vector<1x1x2x128xf32>
    %19 = vector.shape_cast %18 : vector<1x1x2x128xf32> to vector<2x128xf32>
    %20 = vector.broadcast %17 : f32 to vector<2x128xf32>
    %21 = arith.mulf %20, %19 : vector<2x128xf32>
    %22 = arith.addf %16, %21 : vector<2x128xf32>
    %23 = math.tanh %22 : vector<2x128xf32>
    %c0_16 = arith.constant 0 : index
    %c0_17 = arith.constant 0 : index
    %c0_18 = arith.constant 0 : index
    %c0_19 = arith.constant 0 : index
    %24 = vector.load %arg4[%c0_16, %c0_17, %c0_18, %c0_19] : memref<1x3x2x128xf32, #tpu.memory_space<vmem>>, vector<1x1x2x128xf32>
    %25 = vector.shape_cast %24 : vector<1x1x2x128xf32> to vector<2x128xf32>
    %26 = vector.shape_cast %23 : vector<2x128xf32> to vector<1x1x2x128xf32>
    tpu.vector_store %arg4[%c0_16, %c0_17, %c0_18, %c0_19], %26 {strides = array<i32>} : memref<1x3x2x128xf32, #tpu.memory_space<vmem>>, vector<1x1x2x128xf32>,
    %c4 = arith.constant 4 : index
    %27 = memref.load %arg2[%c4] : memref<12xf32, #tpu.memory_space<smem>>
    %c0_20 = arith.constant 0 : index
    %c0_21 = arith.constant 0 : index
    %c0_22 = arith.constant 0 : index
    %c0_23 = arith.constant 0 : index
    %28 = vector.load %arg3[%c0_20, %c0_21, %c0_22, %c0_23] : memref<1x4x2x128xf32, #tpu.memory_space<vmem>>, vector<1x1x2x128xf32>
    %29 = vector.shape_cast %28 : vector<1x1x2x128xf32> to vector<2x128xf32>
    %30 = vector.broadcast %27 : f32 to vector<2x128xf32>
    %31 = arith.mulf %30, %29 : vector<2x128xf32>
    %c5 = arith.constant 5 : index
    %32 = memref.load %arg2[%c5] : memref<12xf32, #tpu.memory_space<smem>>
    %c0_24 = arith.constant 0 : index
    %c1_25 = arith.constant 1 : index
    %c0_26 = arith.constant 0 : index
    %c0_27 = arith.constant 0 : index
    %33 = vector.load %arg3[%c0_24, %c1_25, %c0_26, %c0_27] : memref<1x4x2x128xf32, #tpu.memory_space<vmem>>, vector<1x1x2x128xf32>
    %34 = vector.shape_cast %33 : vector<1x1x2x128xf32> to vector<2x128xf32>
    %35 = vector.broadcast %32 : f32 to vector<2x128xf32>
    %36 = arith.mulf %35, %34 : vector<2x128xf32>
    %37 = arith.addf %31, %36 : vector<2x128xf32>
    %c6 = arith.constant 6 : index
    %38 = memref.load %arg2[%c6] : memref<12xf32, #tpu.memory_space<smem>>
    %c0_28 = arith.constant 0 : index
    %c2_29 = arith.constant 2 : index
    %c0_30 = arith.constant 0 : index
    %c0_31 = arith.constant 0 : index
    %39 = vector.load %arg3[%c0_28, %c2_29, %c0_30, %c0_31] : memref<1x4x2x128xf32, #tpu.memory_space<vmem>>, vector<1x1x2x128xf32>
    %40 = vector.shape_cast %39 : vector<1x1x2x128xf32> to vector<2x128xf32>
    %41 = vector.broadcast %38 : f32 to vector<2x128xf32>
    %42 = arith.mulf %41, %40 : vector<2x128xf32>
    %43 = arith.addf %37, %42 : vector<2x128xf32>
    %c7 = arith.constant 7 : index
    %44 = memref.load %arg2[%c7] : memref<12xf32, #tpu.memory_space<smem>>
    %c0_32 = arith.constant 0 : index
    %c3_33 = arith.constant 3 : index
    %c0_34 = arith.constant 0 : index
    %c0_35 = arith.constant 0 : index
    %45 = vector.load %arg3[%c0_32, %c3_33, %c0_34, %c0_35] : memref<1x4x2x128xf32, #tpu.memory_space<vmem>>, vector<1x1x2x128xf32>
    %46 = vector.shape_cast %45 : vector<1x1x2x128xf32> to vector<2x128xf32>
    %47 = vector.broadcast %44 : f32 to vector<2x128xf32>
    %48 = arith.mulf %47, %46 : vector<2x128xf32>
    %49 = arith.addf %43, %48 : vector<2x128xf32>
    %50 = math.tanh %49 : vector<2x128xf32>
    %c0_36 = arith.constant 0 : index
    %c1_37 = arith.constant 1 : index
    %c0_38 = arith.constant 0 : index
    %c0_39 = arith.constant 0 : index
    %51 = vector.load %arg4[%c0_36, %c1_37, %c0_38, %c0_39] : memref<1x3x2x128xf32, #tpu.memory_space<vmem>>, vector<1x1x2x128xf32>
    %52 = vector.shape_cast %51 : vector<1x1x2x128xf32> to vector<2x128xf32>
    %53 = vector.shape_cast %50 : vector<2x128xf32> to vector<1x1x2x128xf32>
    tpu.vector_store %arg4[%c0_36, %c1_37, %c0_38, %c0_39], %53 {strides = array<i32>} : memref<1x3x2x128xf32, #tpu.memory_space<vmem>>, vector<1x1x2x128xf32>,
    %c8 = arith.constant 8 : index
    %54 = memref.load %arg2[%c8] : memref<12xf32, #tpu.memory_space<smem>>
    %c0_40 = arith.constant 0 : index
    %c0_41 = arith.constant 0 : index
    %c0_42 = arith.constant 0 : index
    %c0_43 = arith.constant 0 : index
    %55 = vector.load %arg3[%c0_40, %c0_41, %c0_42, %c0_43] : memref<1x4x2x128xf32, #tpu.memory_space<vmem>>, vector<1x1x2x128xf32>
    %56 = vector.shape_cast %55 : vector<1x1x2x128xf32> to vector<2x128xf32>
    %57 = vector.broadcast %54 : f32 to vector<2x128xf32>
    %58 = arith.mulf %57, %56 : vector<2x128xf32>
    %c9 = arith.constant 9 : index
    %59 = memref.load %arg2[%c9] : memref<12xf32, #tpu.memory_space<smem>>
    %c0_44 = arith.constant 0 : index
    %c1_45 = arith.constant 1 : index
    %c0_46 = arith.constant 0 : index
    %c0_47 = arith.constant 0 : index
    %60 = vector.load %arg3[%c0_44, %c1_45, %c0_46, %c0_47] : memref<1x4x2x128xf32, #tpu.memory_space<vmem>>, vector<1x1x2x128xf32>
    %61 = vector.shape_cast %60 : vector<1x1x2x128xf32> to vector<2x128xf32>
    %62 = vector.broadcast %59 : f32 to vector<2x128xf32>
    %63 = arith.mulf %62, %61 : vector<2x128xf32>
    %64 = arith.addf %58, %63 : vector<2x128xf32>
    %c10 = arith.constant 10 : index
    %65 = memref.load %arg2[%c10] : memref<12xf32, #tpu.memory_space<smem>>
    %c0_48 = arith.constant 0 : index
    %c2_49 = arith.constant 2 : index
    %c0_50 = arith.constant 0 : index
    %c0_51 = arith.constant 0 : index
    %66 = vector.load %arg3[%c0_48, %c2_49, %c0_50, %c0_51] : memref<1x4x2x128xf32, #tpu.memory_space<vmem>>, vector<1x1x2x128xf32>
    %67 = vector.shape_cast %66 : vector<1x1x2x128xf32> to vector<2x128xf32>
    %68 = vector.broadcast %65 : f32 to vector<2x128xf32>
    %69 = arith.mulf %68, %67 : vector<2x128xf32>
    %70 = arith.addf %64, %69 : vector<2x128xf32>
    %c11 = arith.constant 11 : index
    %71 = memref.load %arg2[%c11] : memref<12xf32, #tpu.memory_space<smem>>
    %c0_52 = arith.constant 0 : index
    %c3_53 = arith.constant 3 : index
    %c0_54 = arith.constant 0 : index
    %c0_55 = arith.constant 0 : index
    %72 = vector.load %arg3[%c0_52, %c3_53, %c0_54, %c0_55] : memref<1x4x2x128xf32, #tpu.memory_space<vmem>>, vector<1x1x2x128xf32>
    %73 = vector.shape_cast %72 : vector<1x1x2x128xf32> to vector<2x128xf32>
    %74 = vector.broadcast %71 : f32 to vector<2x128xf32>
    %75 = arith.mulf %74, %73 : vector<2x128xf32>
    %76 = arith.addf %70, %75 : vector<2x128xf32>
    %77 = math.tanh %76 : vector<2x128xf32>
    %c0_56 = arith.constant 0 : index
    %c2_57 = arith.constant 2 : index
    %c0_58 = arith.constant 0 : index
    %c0_59 = arith.constant 0 : index
    %78 = vector.load %arg4[%c0_56, %c2_57, %c0_58, %c0_59] : memref<1x3x2x128xf32, #tpu.memory_space<vmem>>, vector<1x1x2x128xf32>
    %79 = vector.shape_cast %78 : vector<1x1x2x128xf32> to vector<2x128xf32>
    %80 = vector.shape_cast %77 : vector<2x128xf32> to vector<1x1x2x128xf32>
    tpu.vector_store %arg4[%c0_56, %c2_57, %c0_58, %c0_59], %80 {strides = array<i32>} : memref<1x3x2x128xf32, #tpu.memory_space<vmem>>, vector<1x1x2x128xf32>,
    return
  }
  func.func @transform_0(%arg0: i32, %arg1: i32, %arg2: memref<12xf32, #tpu.memory_space<smem>>) -> (i32, i32, i32, i32) {
    %c0_i32 = arith.constant 0 : i32
    %c0_i32_0 = arith.constant 0 : i32
    %c0_i32_1 = arith.constant 0 : i32
    return %arg0, %c0_i32, %arg1, %c0_i32_0 : i32, i32, i32, i32
  }
  func.func @transform_1(%arg0: i32, %arg1: i32, %arg2: memref<12xf32, #tpu.memory_space<smem>>) -> (i32, i32, i32, i32) {
    %c0_i32 = arith.constant 0 : i32
    %c0_i32_0 = arith.constant 0 : i32
    %c0_i32_1 = arith.constant 0 : i32
    return %arg0, %c0_i32, %arg1, %c0_i32_0 : i32, i32, i32, i32
  }
}

</mosaic_0001>

<bundles_post_ra>
// kernel: output_inter_block.1
= control target key start
LH: loop header
LB: loop body
LE: loop exit
PB: predicated region body
PF: predicated region fallthrough
CT: control target
= control target key end

     0   :  { %s479_s0 = inlined_call_operand.vmem [shape: f32[12], index: 0, kind: input, shape index: {}]   ;;  %s480_s1 = inlined_call_operand.vmem [shape: f32[2,4,2,128], index: 1, kind: input, shape index: {}]   ;;  %s481_s2 = inlined_call_operand.vmem [shape: f32[2,3,2,128], index: 2, kind: output, shape index: {}]  }
   0x1   :  { %s7_s11 = sshll.u32 %s479_s0, 4  ;;  %s8_s11 = int_to_ptr.vmem [resolvable:$true] %s7_s11 }
   0x2   :  { %s371_s12 = scalar_lea.vmem %s8_s11, 16  ;;  %p376_p1 = scmp.lt.s32.totalorder %s8_s11, %s8_s11 }
   0x3   :  { %p372_p0 = scmp.ne.s32.totalorder %s8_s11, %s371_s12  ;;  %p377_p2 = scmp.lt.s32.totalorder %s371_s12, %s371_s12 }
   0x5   :  { %p378_p3 = por %p377_p2, %p376_p1 }
   0x7   :  { %p379_p4 = pnand %p378_p3, %p372_p0 }
   0x9   :  { %382 = shalt.err (!%p379_p4)  }
   0xa   :  { %s409_s13 = smov [#allocation3]  }
   0xb   :  { %10 = dma.vmem_to_smem %s8_s11, 16, %s409_s13, [#allocation2] }
   0xc   :  { %395 = dma.done.wait [#allocation2], 16 }
   0xd   :  { %396 = vsyncadd [#allocation2], 4294967280 }
   0xe   :  { %12 = sfence }
   0xf   :  { %s428_s14 = smov 0   ;;  %s430_s15 = smov 0  }
  0x10   :  { %s432_s16 = smov 0  }
  0x11 LB: > { %s30_s0 = sadd.s32 1, %s403_s15  ;;  %p310_p5 = scmp.ge.s32.totalorder %s407_s16, 1  ;;  %s407_s16 = sphi %s432_s16, %s18_s16   ;;  %s403_s15 = sphi %s430_s15, %s483_s15   ;;  %s399_s14 = sphi %s428_s14, %s482_s14  }
  0x12   : > { %p32_p6 = scmp.ge.s32.totalorder %s30_s0, 2  ;;  %p113_p7 = scmp.lt.s32.totalorder %s407_s16, 3 }
  0x14   : > { %s485_s0 = smov (%p32_p6, %s30_s0), 0  ;;  %p114_p8 = pnand %p310_p5, %p113_p7 }
  0x15   : > { %p139_p9 = scmp.lt.s32.totalorder (!%p114_p8), %s399_s14, 1  ;;  %s155_s17 = sld [smem:[#allocation3]] (!%p114_p8) }
  0x16   : > { %117 = sbr.rel (%p114_p8) target bundleno = 62 (0x3e), region = 24  ;;  %s314_s18 = sld [smem:[#allocation3 + $0x1]] (!%p114_p8) }
  0x17   : > { %s316_s19 = sld [smem:[#allocation3 + $0x2]] (!%p114_p8) }
  0x18   : > { %s318_s24 = sld [smem:[#allocation3 + $0x3]] (!%p114_p8) }
  0x19   : > { %s320_s25 = sld [smem:[#allocation3 + $0x4]] (!%p114_p8) }
  0x1a   : > { %s321_s26 = sld [smem:[#allocation3 + $0x5]] (!%p114_p8) }
  0x1b   : > { %s487_s14 = smov (!%p139_p9, %s399_s14), 1  ;;  %v157_v1 = vstv %s155_s17  ;;  %s323_s27 = sld [smem:[#allocation3 + $0x6]] }
  0x1c   : > { %s338_s20 = sshll.u32 %s487_s14, 3  ;;  %v162_v4 = vstv %s314_s18  ;;  %s325_s28 = sld [smem:[#allocation3 + $0x7]] }
  0x1d   : > { %s452_s23 = scalar_lea.vmem %s480_s1, %s338_s20  ;;  %v168_v7 = vstv %s316_s19  ;;  %s328_s29 = sld [smem:[#allocation3 + $0x8]] }
  0x1e   : > { %v156_v0 = vld [vmem:[%s452_s23] sm:$0x3]  ;;  %v315_v2 = vld [vmem:[%s452_s23 + $0x2] sm:$0x3]  ;;  %v317_v5 = vld [vmem:[%s452_s23 + $0x4] sm:$0x3]  ;;  %v174_v11 = vstv %s318_s24 }
  0x1f   : > { %v158_v3 = vmul.f32 %v157_v1, %v156_v0  ;;  %v163_v6 = vmul.f32 %v315_v2, %v162_v4  ;;  %v319_v8 = vld [vmem:[%s452_s23 + $0x6] sm:$0x3]  ;;  %v169_v10 = vmul.f32 %v317_v5, %v168_v7  ;;  %v180_v12 = vld [vmem:[%s452_s23] sm:$0x3]  ;;  %v322_v15 = vld [vmem:[%s452_s23 + $0x2] sm:$0x3]  ;;  %v181_v16 = vstv %s320_s25 }
  0x20   : > { %v175_v14 = vmul.f32 %v319_v8, %v174_v11  ;;  %s329_s30 = sld [smem:[#allocation3 + $0x9]]  ;;  %v324_v17 = vld [vmem:[%s452_s23 + $0x4] sm:$0x3]  ;;  %v182_v19 = vmul.f32 %v181_v16, %v180_v12  ;;  %v185_v20 = vstv %s321_s26  ;;  %v326_v21 = vld [vmem:[%s452_s23 + $0x6] sm:$0x3]  ;;  %s339_s5 = smul.u32 6, %s487_s14 }
  0x21   : > { %v164_v9 = vadd.f32 %v163_v6, %v158_v3  ;;  %s331_s3 = sld [smem:[#allocation3 + $0xa]]  ;;  %v186_v22 = vmul.f32 %v322_v15, %v185_v20  ;;  %v190_v23 = vstv %s323_s27  ;;  %v202_v24 = vld [vmem:[%s452_s23] sm:$0x3]  ;;  %v330_v27 = vld [vmem:[%s452_s23 + $0x2] sm:$0x3] }
  0x22   : > { %s333_s4 = sld [smem:[#allocation3 + $0xb]]  ;;  %v191_v25 = vmul.f32 %v324_v17, %v190_v23  ;;  %v195_v26 = vstv %s325_s28  ;;  %v332_v31 = vld [vmem:[%s452_s23 + $0x4] sm:$0x3]  ;;  %v334_v34 = vld [vmem:[%s452_s23 + $0x6] sm:$0x3]  ;;  %s154_s8 = scalar_lea.vmem %s481_s2, %s339_s5 }
  0x23   : > { %v170_v13 = vadd.f32 %v169_v10, %v164_v9  ;;  %v187_v28 = vadd.f32 %v186_v22, %v182_v19  ;;  %v196_v29 = vmul.f32 %v326_v21, %v195_v26  ;;  %v203_v30 = vstv %s328_s29 }
  0x24   : > { %v204_v32 = vmul.f32 %v203_v30, %v202_v24 }
  0x25   : > { %v176_v18 = vadd.f32 %v175_v14, %v170_v13  ;;  %v192_v35 = vadd.f32 %v191_v25, %v187_v28 }
  0x26   : > { %v207_v33 = vstv %s329_s30 }
  0x27   : > { %365 = vtanh.f32 %v176_v18  ;;  %v208_v36 = vmul.f32 %v330_v27, %v207_v33  ;;  %v212_v37 = vstv %s331_s3  ;;  %v197_v40 = vadd.f32 %v196_v29, %v192_v35 }
  0x28   : > { %v213_v38 = vmul.f32 %v332_v31, %v212_v37  ;;  %v217_v39 = vstv %s333_s4 }
  0x29   : > { %v209_v41 = vadd.f32 %v208_v36, %v204_v32  ;;  %v218_v42 = vmul.f32 %v334_v34, %v217_v39  ;;  %367 = vtanh.f32 %v197_v40 }
  0x2b   : > { %v214_v43 = vadd.f32 %v213_v38, %v209_v41 }
  0x2d   : > { %v219_v44 = vadd.f32 %v218_v42, %v214_v43 }
  0x2f   : > { %369 = vtanh.f32 %v219_v44 }
  0x34   : > { %v366_v45 = vpop.eup %365 }
  0x35   : > { %178 = vst [vmem:[%s154_s8] sm:$0x3] %v366_v45 }
  0x36   : > { %v368_v46 = vpop.eup %367 }
  0x37   : > { %327 = vst [vmem:[%s154_s8 + $0x2] sm:$0x3] %v368_v46 }
  0x3c   : > { %v370_v47 = vpop.eup %369 }
  0x3d   : > { %335 = vst [vmem:[%s154_s8 + $0x4] sm:$0x3] %v370_v47 }
  0x3e PF: > { %s18_s16 = sadd.s32 1, %s407_s16   ;;  %s482_s14 = smov %s403_s15 }
  0x3f   : > { %p15_p10 = scmp.ge.s32.totalorder %s18_s16, 4   ;;  %s483_s15 = smov %s485_s0 }
  0x41   :  { %17 = sbr.rel (!%p15_p10) target bundleno = 17 (0x11), region = 59 }

</bundles_post_ra>
